<compile_context>
chip_gen: v7x
topology: tpu7x:2x2x1
jax: 0.10.0
libtpu: 0.0.40
codegen_flags: <defaults>
</compile_context>

<pallas_src>
import math

import jax
import jax.numpy as jnp
from jax.experimental import pallas as pl
from jax.experimental.pallas import tpu as pltpu


def _round_up(x, m):
    return ((x + m - 1) // m) * m


# ----------------------------------------------------------------------------
# Fused chain kernel: one grid step = one tile of `tm` batch rows run through
# every Kronecker factor, bias added once after the last factor.
# ----------------------------------------------------------------------------
def _ks_fused_kernel(x_ref, *refs):
    n_factors = len(refs) - 2
    wt_refs = refs[:n_factors]
    b_ref = refs[n_factors]          # (1, N_last_padded) float32
    o_ref = refs[n_factors + 1]      # (tm, N_last_padded)

    h = x_ref[...]                   # (tm, K0_padded), compute dtype (bf16)
    acc = None
    for i, wt_ref in enumerate(wt_refs):
        # MXU matmul, f32 accumulation.
        acc = jnp.dot(h, wt_ref[...], preferred_element_type=jnp.float32)
        if i + 1 < n_factors:
            # Back to the narrow compute dtype for the next MXU pass; the
            # intermediate never leaves VMEM.
            h = acc.astype(x_ref.dtype)
    out = acc + b_ref[...]           # f32 bias broadcast, added exactly once
    o_ref[...] = out.astype(o_ref.dtype)


# ----------------------------------------------------------------------------
# Parameter construction (init-time glue, plain JAX): dense Kronecker factor
# I_a (x) 1_{b,c} (x) I_d from a 4D weight of shape (a, b, c, d); equivalent
# of torch `from_abcd_to_dense`.
# ----------------------------------------------------------------------------
def from_abcd_to_dense(w4):
    a, b, c, d = w4.shape
    eye = jnp.eye(d, dtype=w4.dtype)
    de = w4[..., :, None] * eye                          # (a, b, c, d, d) diag_embed
    de = jnp.transpose(de, (0, 1, 3, 2, 4)).reshape(a, b * d, c * d)
    dense = jnp.zeros((a * b * d, a * c * d), dtype=w4.dtype)
    for i in range(a):                                   # block_diag over a
        dense = dense.at[i * b * d:(i + 1) * b * d,
                         i * c * d:(i + 1) * c * d].set(de[i])
    return dense                                         # (out_i, in_i) torch-style


class KSLinearPallas:
    """JAX/Pallas port of KSLinear(algo='dense', bs_last=False).

    patterns: list of (a, b, c, d), rightmost factor first.
    Factors initialized uniform(-1/sqrt(c), 1/sqrt(c)) on the (a,b,c,d) support,
    matching the module's init scheme.
    """

    def __init__(self, patterns, key, bias=True, dtype=jnp.float32,
                 compute_dtype=jnp.bfloat16):
        assert len(patterns) >= 1
        for p in patterns:
            assert len(p) == 4
        for p_prev, p_next in zip(patterns[:-1], patterns[1:]):
            assert p_prev[0] * p_prev[1] * p_prev[3] == p_next[0] * p_next[2] * p_next[3], \
                "factor chain dimension mismatch"
        self.patterns = patterns
        self.dtype = dtype
        self.compute_dtype = compute_dtype
        self.in_size = patterns[0][0] * patterns[0][2] * patterns[0][3]
        self.out_size = patterns[-1][0] * patterns[-1][1] * patterns[-1][3]

        # Feature widths along the chain and their 128-padded (lane-dense) sizes.
        self._dims = [self.in_size] + [p[0] * p[1] * p[3] for p in patterns]
        self._pdims = [_round_up(d, 128) for d in self._dims]

        # Build dense factors, pre-transpose to (K, N), zero-pad, cast to bf16.
        # TODO(synk): exploit the block-diagonal (a blocks) structure instead of
        # a dense (a*b*d, a*c*d) matmul to save a-fold MXU FLOPs / weight bytes.
        self._wts = []
        for i, p in enumerate(patterns):
            a, b, c, d = p
            key, sub = jax.random.split(key)
            scaling = 1.0 / math.sqrt(c)
            w4 = jax.random.uniform(sub, (a, b, c, d), dtype=jnp.float32,
                                    minval=-scaling, maxval=scaling)
            dense = from_abcd_to_dense(w4)               # (out_i, in_i)
            kp, np_ = self._pdims[i], self._pdims[i + 1]
            wt = jnp.zeros((kp, np_), compute_dtype)
            wt = wt.at[:dense.shape[1], :dense.shape[0]].set(
                jnp.transpose(dense).astype(compute_dtype))
            self._wts.append(wt)

        # Bias stays float32 (added once, after the last factor).
        brow = jnp.zeros((1, self._pdims[-1]), jnp.float32)
        if bias:
            key, sub = jax.random.split(key)
            bound = 1.0 / math.sqrt(self.in_size)
            bvals = jax.random.uniform(sub, (self.out_size,), dtype=jnp.float32,
                                       minval=-bound, maxval=bound)
            brow = brow.at[0, :self.out_size].set(bvals)
            self.bias = bvals
        else:
            self.bias = None
        self._bias_row = brow

        self._forward_jit = jax.jit(self._forward)

    # ------------------------------------------------------------------ #
    def _pallas_chain(self, x_p, tm):
        """x_p: (Mp, K0_padded) compute dtype, Mp multiple of tm."""
        Mp = x_p.shape[0]
        K0p = self._pdims[0]
        NLp = self._pdims[-1]

        # VMEM budget (weights resident + double-buffered row tiles), capped
        # well below v7x's 64 MiB physical VMEM.
        cbytes = jnp.dtype(self.compute_dtype).itemsize
        obytes = jnp.dtype(self.dtype).itemsize
        est = sum(int(w.size) * cbytes for w in self._wts)
        est += int(self._bias_row.size) * 4
        est += 2 * tm * K0p * cbytes          # double-buffered input tiles
        est += 2 * tm * NLp * obytes          # double-buffered output tiles
        est += 2 * tm * max(self._pdims) * 4  # f32 intermediates in flight
        vmem_limit = int(min(48 * 1024 * 1024,
                             max(32 * 1024 * 1024, est * 3 // 2)))

        in_specs = [pl.BlockSpec((tm, K0p), lambda i: (i, 0))]
        for w in self._wts:
            kp, np_ = w.shape
            # Constant index map: weight DMA'd once, resident across grid steps.
            in_specs.append(pl.BlockSpec((kp, np_), lambda i: (0, 0)))
        in_specs.append(pl.BlockSpec((1, NLp), lambda i: (0, 0)))
        out_specs = pl.BlockSpec((tm, NLp), lambda i: (i, 0))

        # TODO(synk): for very wide factors that do not fit VMEM, add K/N grid
        # axes per factor with an f32 accumulator scratch and pl.when finalize.
        return pl.pallas_call(
            _ks_fused_kernel,
            out_shape=jax.ShapeDtypeStruct((Mp, NLp), self.dtype),
            grid=(Mp // tm,),
            in_specs=in_specs,
            out_specs=out_specs,
            compiler_params=pltpu.CompilerParams(
                dimension_semantics=("parallel",),
                vmem_limit_bytes=vmem_limit),
        )(x_p, *self._wts, self._bias_row)

    def _forward(self, x):
        sizes = x.shape[:-1]
        h = x.reshape(-1, self.in_size).astype(self.compute_dtype)
        M = h.shape[0]
        tm = 256 if M >= 256 else _round_up(max(M, 1), 8)
        Mp = _round_up(max(M, 1), tm)
        h = jnp.pad(h, ((0, Mp - M), (0, self._pdims[0] - self.in_size)))
        y = self._pallas_chain(h, tm)
        y = y[:M, :self.out_size]
        return y.reshape(*sizes, self.out_size)

    def __call__(self, x):
        return self._forward_jit(x)

    # Pure-JAX reference implementing the same (bf16 operands, f32 accumulate)
    # math, for in-script correctness checking.
    def reference(self, x):
        sizes = x.shape[:-1]
        h = x.reshape(-1, self.in_size).astype(self.compute_dtype)
        h = jnp.pad(h, ((0, 0), (0, self._pdims[0] - self.in_size)))
        acc = None
        for i, wt in enumerate(self._wts):
            acc = jnp.dot(h, wt, preferred_element_type=jnp.float32)
            if i + 1 < len(self._wts):
                h = acc.astype(self.compute_dtype)
        out = acc + self._bias_row
        out = out[:, :self.out_size].astype(self.dtype)
        return out.reshape(*sizes, self.out_size)


if __name__ == "__main__":
    key = jax.random.PRNGKey(0)
    # patterns (rightmost factor first):
    #   (2, 8, 4, 2):  in = a*c*d = 16, out = a*b*d = 32
    #   (1, 16, 16, 2): in = 32,        out = 32
    patterns = [(2, 8, 4, 2), (1, 16, 16, 2)]

    key, kparam, kx = jax.random.split(key, 3)
    layer = KSLinearPallas(patterns, kparam, bias=True, dtype=jnp.float32)

    # small input consistent with the module: (..., in_size) = (2, 4, 16)
    x = jax.random.normal(kx, (2, 4, layer.in_size), dtype=jnp.float32)

    y = layer(x)
    jax.block_until_ready(y)
    assert y.shape == (2, 4, layer.out_size), y.shape

    y_ref = layer.reference(x)
    max_err = float(jnp.max(jnp.abs(y - y_ref)))
    assert jnp.allclose(y, y_ref, rtol=1e-2, atol=1e-2), max_err

    print("KERNEL_OK")
</pallas_src>

<mosaic_0001>
module attributes {stable_mosaic.version = 11 : i64} {
  func.func @_ks_fused_kernel(%arg0: i32, %arg1: memref<8x128xbf16, #tpu.memory_space<vmem>>, %arg2: memref<128x128xbf16, #tpu.memory_space<vmem>>, %arg3: memref<128x128xbf16, #tpu.memory_space<vmem>>, %arg4: memref<1x128xf32, #tpu.memory_space<vmem>>, %arg5: memref<8x128xf32, #tpu.memory_space<vmem>>) attributes {dimension_semantics = [#tpu.dimension_semantics<parallel>], iteration_bounds = array<i64: 1>, scalar_prefetch = 0 : i64, scratch_operands = 0 : i64, tpu.core_type = #tpu.core_type<tc>, window_params = [{transform_indices = @transform_0, window_bounds = array<i64: 8, 128>}, {pipeline_mode = #tpu.pipeline_mode<synchronous>, transform_indices = @transform_1, window_bounds = array<i64: 128, 128>}, {pipeline_mode = #tpu.pipeline_mode<synchronous>, transform_indices = @transform_2, window_bounds = array<i64: 128, 128>}, {pipeline_mode = #tpu.pipeline_mode<synchronous>, transform_indices = @transform_3, window_bounds = array<i64: 1, 128>}, {transform_indices = @transform_4, window_bounds = array<i64: 8, 128>}]} {
    %c0 = arith.constant 0 : index
    %c0_0 = arith.constant 0 : index
    %0 = vector.load %arg1[%c0, %c0_0] : memref<8x128xbf16, #tpu.memory_space<vmem>>, vector<8x128xbf16>
    %c0_1 = arith.constant 0 : index
    %c0_2 = arith.constant 0 : index
    %1 = vector.load %arg2[%c0_1, %c0_2] : memref<128x128xbf16, #tpu.memory_space<vmem>>, vector<128x128xbf16>
    %cst = arith.constant dense<0.000000e+00> : vector<8x128xf32>
    %2 = tpu.matmul %0, %1, %cst {dimension_numbers = #tpu.dot_dimension_numbers<[1], [0], [0], [1], [0, 0, 1, 1], [], []>} : vector<8x128xbf16>, vector<128x128xbf16>, vector<8x128xf32> -> vector<8x128xf32>
    %3 = arith.truncf %2 : vector<8x128xf32> to vector<8x128xbf16>
    %c0_3 = arith.constant 0 : index
    %c0_4 = arith.constant 0 : index
    %4 = vector.load %arg3[%c0_3, %c0_4] : memref<128x128xbf16, #tpu.memory_space<vmem>>, vector<128x128xbf16>
    %cst_5 = arith.constant dense<0.000000e+00> : vector<8x128xf32>
    %5 = tpu.matmul %3, %4, %cst_5 {dimension_numbers = #tpu.dot_dimension_numbers<[1], [0], [0], [1], [0, 0, 1, 1], [], []>} : vector<8x128xbf16>, vector<128x128xbf16>, vector<8x128xf32> -> vector<8x128xf32>
    %c0_6 = arith.constant 0 : index
    %c0_7 = arith.constant 0 : index
    %6 = vector.load %arg4[%c0_6, %c0_7] : memref<1x128xf32, #tpu.memory_space<vmem>>, vector<1x128xf32>
    %7 = vector.broadcast %6 : vector<1x128xf32> to vector<8x128xf32>
    %8 = arith.addf %5, %7 : vector<8x128xf32>
    %c0_8 = arith.constant 0 : index
    %c0_9 = arith.constant 0 : index
    %9 = vector.load %arg5[%c0_8, %c0_9] : memref<8x128xf32, #tpu.memory_space<vmem>>, vector<8x128xf32>
    tpu.vector_store %arg5[%c0_8, %c0_9], %8 {strides = array<i32>} : memref<8x128xf32, #tpu.memory_space<vmem>>, vector<8x128xf32>,
    return
  }
  func.func @transform_0(%arg0: i32) -> (i32, i32) {
    %c0_i32 = arith.constant 0 : i32
    %c0_i32_0 = arith.constant 0 : i32
    return %arg0, %c0_i32 : i32, i32
  }
  func.func @transform_1(%arg0: i32) -> (i32, i32) {
    %c0_i32 = arith.constant 0 : i32
    %c0_i32_0 = arith.constant 0 : i32
    %c0_i32_1 = arith.constant 0 : i32
    return %c0_i32, %c0_i32_0 : i32, i32
  }
  func.func @transform_2(%arg0: i32) -> (i32, i32) {
    %c0_i32 = arith.constant 0 : i32
    %c0_i32_0 = arith.constant 0 : i32
    %c0_i32_1 = arith.constant 0 : i32
    return %c0_i32, %c0_i32_0 : i32, i32
  }
  func.func @transform_3(%arg0: i32) -> (i32, i32) {
    %c0_i32 = arith.constant 0 : i32
    %c0_i32_0 = arith.constant 0 : i32
    %c0_i32_1 = arith.constant 0 : i32
    return %c0_i32, %c0_i32_0 : i32, i32
  }
  func.func @transform_4(%arg0: i32) -> (i32, i32) {
    %c0_i32 = arith.constant 0 : i32
    %c0_i32_0 = arith.constant 0 : i32
    return %arg0, %c0_i32 : i32, i32
  }
}

</mosaic_0001>

<bundles_post_ra>
// kernel: _forward.1
= control target key start
LH: loop header
LB: loop body
LE: loop exit
PB: predicated region body
PF: predicated region fallthrough
CT: control target
= control target key end

     0   :  { %9 = vsyncpa [#allocation3], 0  ;;  %s525_s0 = inlined_call_operand.vmem [shape: bf16[8,128], index: 0, kind: input, shape index: {}]   ;;  %s526_s1 = inlined_call_operand.hbm [shape: bf16[128,128], index: 1, kind: input, shape index: {}]   ;;  %s527_s2 = inlined_call_operand.hbm [shape: bf16[128,128], index: 2, kind: input, shape index: {}]   ;;  %s528_s3 = inlined_call_operand.vmem [shape: f32[1,128], index: 3, kind: input, shape index: {}]   ;;  %s529_s4 = inlined_call_operand.hbm [shape: f32[8,128], index: 4, kind: output, shape index: {}]  }
   0x1   :  { %10 = vsyncpa [#allocation6], 0 }
   0x2   :  { %11 = vsyncpa [#allocation4], 0  ;;  %s451_s15 = smov [#allocation2]   ;;  %s379_s19 = scalar_lea.hbm %s526_s1, 1024 }
   0x3   :  { %s19_s16 = sshll.u32 %s451_s15, 4  ;;  %p380_p0 = scmp.ne.s32.totalorder %s526_s1, %s379_s19  ;;  %s20_s16 = int_to_ptr.vmem [resolvable:$true] %s19_s16 }
   0x4   :  { %p383_p1 = scmp.lt.u32.totalorder %s379_s19, %s526_s1 }
   0x6   :  { %p385_p2 = pnand %p383_p1, %p380_p0 }
   0x8   :  { %388 = shalt.err (!%p385_p2)
}
   0x9   :  { %s389_s24 = scalar_lea.vmem %s20_s16, 1024  ;;  %p394_p4 = scmp.lt.s32.totalorder %s20_s16, %s20_s16 }
   0xa   :  { %p390_p3 = scmp.ne.s32.totalorder %s20_s16, %s389_s24  ;;  %p395_p5 = scmp.lt.s32.totalorder %s389_s24, %s389_s24 }
   0xc   :  { %p396_p6 = por %p395_p5, %p394_p4 }
   0xe   :  { %p397_p7 = pnand %p396_p6, %p390_p3 }
  0x10   :  { %400 = shalt.err (!%p397_p7)
}
  0x11   :  { %s452_s25 = smov 64   ;;  %s453_s26 = smov 4  }
  0x12   :  { %25 = dma.hbm_to_vmem [thread:$0]  %s526_s1, 1024, %s20_s16, [#allocation3], %s452_s25, %s452_s25, %s453_s26  }
  0x13   :  { %s454_s29 = smov [#allocation5]   ;;  %s401_s7 = scalar_lea.hbm %s527_s2, 1024 }
  0x14   :  { %s31_s30 = sshll.u32 %s454_s29, 4  ;;  %p402_p8 = scmp.ne.s32.totalorder %s527_s2, %s401_s7  ;;  %s32_s30 = int_to_ptr.vmem [resolvable:$true] %s31_s30 }
  0x15   :  { %p405_p9 = scmp.lt.u32.totalorder %s401_s7, %s527_s2 }
  0x17   :  { %p407_p10 = pnand %p405_p9, %p402_p8 }
  0x19   :  { %410 = shalt.err (!%p407_p10)
}
  0x1a   :  { %s411_s12 = scalar_lea.vmem %s32_s30, 1024  ;;  %p416_p12 = scmp.lt.s32.totalorder %s32_s30, %s32_s30 }
  0x1b   :  { %p412_p11 = scmp.ne.s32.totalorder %s32_s30, %s411_s12  ;;  %p417_p13 = scmp.lt.s32.totalorder %s411_s12, %s411_s12 }
  0x1d   :  { %p418_p0 = por %p417_p13, %p416_p12 }
  0x1f   :  { %p419_p1 = pnand %p418_p0, %p412_p11 }
  0x21   :  { %422 = shalt.err (!%p419_p1)
}
  0x22   :  { %37 = dma.hbm_to_vmem [thread:$0]  %s527_s2, 1024, %s32_s30, [#allocation6], %s452_s25, %s452_s25, %s453_s26  }
  0x23   :  { %445 = dma.done.wait [#allocation3], 1024  }
  0x24   :  { %446 = vsyncadd [#allocation3], 4294966272 }
  0x25   :  { %447 = dma.done.wait [#allocation6], 1024  }
  0x26   :  { %448 = vsyncadd [#allocation6], 4294966272  ;;  %v455_v0 = vmov 0.0   ;;  %vm456_vm0 = vmmov 0   ;;  %v363_v1 = vld [vmem:[#allocation2] sm:$0xff]   ;;  %v364_v2 = vld [vmem:[#allocation2 + $0x8] sm:$0xff]  }
  0x27   :  { %316 = vmatprep.subr.bf16.mxu0 %v455_v0  ;;  %332 = vmatprep.mubr.msk.bf16.mxu0 %vm456_vm0, %v455_v0  ;;  %v365_v3 = vld [vmem:[#allocation2 + $0x10] sm:$0xff]   ;;  %v371_v4 = vld [vmem:[#allocation5] sm:$0xff]   ;;  %v366_v5 = vld [vmem:[#allocation2 + $0x18] sm:$0xff]   ;;  %s457_s17 = smov [#allocation7]  }
  0x28   :  { %336 = vmatprep.subr.bf16.mxu1 %v455_v0  ;;  %352 = vmatprep.mubr.msk.bf16.mxu1 %vm456_vm0, %v455_v0  ;;  %v372_v6 = vld [vmem:[#allocation5 + $0x8] sm:$0xff]   ;;  %v367_v7 = vld [vmem:[#allocation2 + $0x20] sm:$0xff]   ;;  %v373_v8 = vld [vmem:[#allocation5 + $0x10] sm:$0xff]  }
  0x29   :  { %317 = vmatpush3.bf16.msra.mxu0 %v363_v1  ;;  %337 = vmatpush3.bf16.msra.mxu1 %v371_v4  ;;  %v368_v9 = vld [vmem:[#allocation2 + $0x28] sm:$0xff]   ;;  %v374_v10 = vld [vmem:[#allocation5 + $0x18] sm:$0xff]   ;;  %v369_v11 = vld [vmem:[#allocation2 + $0x30] sm:$0xff]  }
  0x2a   :  { %318 = vmatprep.subr.bf16.mxu0 %v455_v0  ;;  %338 = vmatprep.subr.bf16.mxu1 %v455_v0  ;;  %v375_v12 = vld [vmem:[#allocation5 + $0x20] sm:$0xff]   ;;  %v370_v13 = vld [vmem:[#allocation2 + $0x38] sm:$0xff]   ;;  %v376_v14 = vld [vmem:[#allocation5 + $0x28] sm:$0xff]  }
  0x2b   :  { %v47_v15 = vld [vmem:[%s525_s0] sm:$0xf]  ;;  %v377_v16 = vld [vmem:[#allocation5 + $0x30] sm:$0xff]   ;;  %v378_v17 = vld [vmem:[#allocation5 + $0x38] sm:$0xff]   ;;  %s271_s0 = sshll.u32 %s457_s17, 4  ;;  %s272_s0 = int_to_ptr.vmem [resolvable:$true] %s271_s0 }
  0x2c   :  { %v289_v23 = vld [vmem:[%s528_s3] ss:$0 sm:$0xff]  ;;  %s423_s18 = scalar_lea.vmem %s272_s0, 128  ;;  %p428_p3 = scmp.lt.s32.totalorder %s272_s0, %s272_s0 }
  0x2d   :  { %319 = vmatpush3.bf16.msra.mxu0 %v364_v2  ;;  %339 = vmatpush3.bf16.msra.mxu1 %v372_v6  ;;  %p424_p2 = scmp.ne.s32.totalorder %s272_s0, %s423_s18  ;;  %p429_p4 = scmp.lt.s32.totalorder %s423_s18, %s423_s18 }
  0x2e   :  { %320 = vmatprep.subr.bf16.mxu0 %v455_v0  ;;  %340 = vmatprep.subr.bf16.mxu1 %v455_v0 }
  0x2f   :  { %p430_p5 = por %p429_p4, %p428_p3 }
  0x31   :  { %321 = vmatpush3.bf16.msra.mxu0 %v365_v3  ;;  %341 = vmatpush3.bf16.msra.mxu1 %v373_v8  ;;  %p431_p6 = pnand %p430_p5, %p424_p2 }
  0x32   :  { %322 = vmatprep.subr.bf16.mxu0 %v455_v0  ;;  %342 = vmatprep.subr.bf16.mxu1 %v455_v0 }
  0x35   :  { %323 = vmatpush3.bf16.msra.mxu0 %v366_v5  ;;  %343 = vmatpush3.bf16.msra.mxu1 %v374_v10 }
  0x36   :  { %324 = vmatprep.subr.bf16.mxu0 %v455_v0  ;;  %344 = vmatprep.subr.bf16.mxu1 %v455_v0 }
  0x39   :  { %325 = vmatpush3.bf16.msra.mxu0 %v367_v7  ;;  %345 = vmatpush3.bf16.msra.mxu1 %v375_v12 }
  0x3a   :  { %326 = vmatprep.subr.bf16.mxu0 %v455_v0  ;;  %346 = vmatprep.subr.bf16.mxu1 %v455_v0 }
  0x3d   :  { %327 = vmatpush3.bf16.msra.mxu0 %v368_v9  ;;  %347 = vmatpush3.bf16.msra.mxu1 %v376_v14 }
  0x3e   :  { %328 = vmatprep.subr.bf16.mxu0 %v455_v0  ;;  %348 = vmatprep.subr.bf16.mxu1 %v455_v0 }
  0x41   :  { %329 = vmatpush3.bf16.msra.mxu0 %v369_v11  ;;  %349 = vmatpush3.bf16.msra.mxu1 %v377_v16 }
  0x42   :  { %330 = vmatprep.subr.bf16.mxu0 %v455_v0  ;;  %350 = vmatprep.subr.bf16.mxu1 %v455_v0 }
  0x45   :  { %331 = vmatpush3.bf16.msra.mxu0 %v370_v13  ;;  %351 = vmatpush3.bf16.msra.mxu1 %v378_v17 }
  0x48   :  { %333 = vmatmul.mubr.bf16.vlgmr.msra.gmra.mrb[0].mxu0 %v47_v15 }
 0x11b   :  { %v146_v18 = vpop.f32.mrb[0].mxu0 }
 0x11c   :  { %v152_v19 = vpack.c.bf16 %v146_v18, %v146_v18  ;;  %v334_v20 = vpop.f32.mrb[1].mxu0 }
 0x11d   :  { %v149_v21 = vpop.f32.mrb[2].mxu0 }
 0x11e   :  { %v335_v22 = vpop.f32.mrb[3].mxu0  ;;  %353 = vmatmul.mubr.bf16.vlgmr.msra.gmra.mrb[0].mxu1 %v152_v19 }
 0x1f1   :  { %v258_v24 = vpop.f32.mrb[0].mxu1 }
 0x1f2   :  { %v259_v25 = vadd.f32 %v289_v23, %v258_v24  ;;  %v354_v26 = vpop.f32.mrb[1].mxu1 }
 0x1f3   :  { %v261_v27 = vpop.f32.mrb[2].mxu1 }
 0x1f4   :  { %264 = vst [vmem:[#allocation7] sm:$0xff] %v259_v25  ;;  %v355_v28 = vpop.f32.mrb[3].mxu1 }
 0x1f5   :  { %434 = shalt.err (!%p431_p6)
}
 0x1f6   :  { %s435_s3 = scalar_lea.hbm %s529_s4, 128 }
 0x1f7   :  { %p436_p7 = scmp.ne.s32.totalorder %s529_s4, %s435_s3  ;;  %p439_p8 = scmp.lt.u32.totalorder %s435_s3, %s529_s4 }
 0x1f9   :  { %p441_p9 = pnand %p439_p8, %p436_p7 }
 0x1fb   :  { %444 = shalt.err (!%p441_p9)
}
 0x1fc   :  { %274 = dma.vmem_to_hbm [thread:$0]  %s272_s0, 128, %s529_s4, [#allocation4]  }
 0x1fd   :  { %449 = dma.done.wait [#allocation4], 128  }
 0x1fe   :  { %450 = vsyncadd [#allocation4], 4294967168 }
 0x1ff   :  { %278 = vsyncpa [#allocation3], 1 }
 0x200   :  { %279 = vsyncpa [#allocation6], 1 }
 0x201   :  { %280 = vsyncpa [#allocation4], 1 }

</bundles_post_ra>
